<compile_context>
chip_gen: v5e
topology: v5e:2x2
jax: 0.10.0
libtpu: 0.0.40
codegen_flags: <defaults>
</compile_context>

<pallas_src>
import functools

import jax
import jax.numpy as jnp
from jax.experimental import pallas as pl
from jax.experimental.pallas import tpu as pltpu

_LANE = 128
_SUBLANE = 8                    # f32 sublane packing (x and out stay f32 in HBM)
_VMEM_TILE_BUDGET = 16 << 20    # conservative vs the 32 MiB scoped default on all gens


def _round_up(x: int, m: int) -> int:
    return (x + m - 1) // m * m


def _pad2(a, rows, cols):
    return jnp.pad(a, ((0, rows - a.shape[0]), (0, cols - a.shape[1])))


def _num_tensorcores() -> int:
    """Best-effort TensorCores-per-device query (v5e/v6e: 1, v7x: 2)."""
    try:
        info = pltpu.get_tpu_info()
        for name in ("num_cores", "core_count", "num_tensorcores",
                     "tensorcores_per_chip", "cores_per_chip"):
            n = getattr(info, name, None)
            if isinstance(n, int) and n > 0:
                return n
    except Exception:
        pass
    kind = getattr(jax.devices()[0], "device_kind", "").lower()
    return 2 if "v7" in kind else 1


def _max_rows_for_vmem(isize: int, h_pad: int, o_pad: int) -> int:
    # Per-row VMEM: double-buffered f32 x tile + f32 out tile, plus ~3 f32
    # h_pad-wide live intermediates. Guards large-isize cases against v7x's
    # smaller VMEM; at DQN sizes this allows thousands of rows per tile.
    row_bytes = 2 * 4 * isize + 2 * 4 * o_pad + 3 * 4 * h_pad
    return max(_SUBLANE, (_VMEM_TILE_BUDGET // row_bytes) // _SUBLANE * _SUBLANE)


def _default_batch_tile(B: int, isize: int, h_pad: int, o_pad: int) -> int:
    n_cores = _num_tensorcores()
    if n_cores >= 2 and B >= 32:
        # Exactly one grid step per TensorCore on 2-TC chips (v7x).
        bt = _round_up(pl.cdiv(B, n_cores), _SUBLANE)
    else:
        # 1-TC chips (v5e/v6e): the grid is a serial loop, so use one big tile.
        bt = _round_up(B, _SUBLANE)
    return min(bt, _max_rows_for_vmem(isize, h_pad, o_pad))


def _dqn_kernel(x_ref, w1_ref, b1_ref, w2_ref, b2_ref, w3_ref, b3_ref, o_ref,
                *, do_clamp: bool):
    """One batch tile of the fused 3-layer MLP; all operands VMEM-resident."""
    # In-kernel bf16 cast of the f32 x tile (VPU, hidden under the DMA/MXU).
    x = x_ref[...].astype(jnp.bfloat16)                       # [bt, isize]

    # L1 + ReLU: bf16 MXU matmul, f32 accumulate; bias/ReLU on the f32 VPU path.
    h = jnp.dot(x, w1_ref[...], preferred_element_type=jnp.float32) + b1_ref[...]
    h = jnp.maximum(h, 0.0)

    # L2 + ReLU
    h = jnp.dot(h.astype(jnp.bfloat16), w2_ref[...],
                preferred_element_type=jnp.float32) + b2_ref[...]
    h = jnp.maximum(h, 0.0)

    # L3 (+ optional Sigmoid)
    out = jnp.dot(h.astype(jnp.bfloat16), w3_ref[...],
                  preferred_element_type=jnp.float32) + b3_ref[...]
    if do_clamp:
        # sigmoid(x) = 1/(1 + exp(-x)); exp + approx reciprocal both run on the
        # otherwise-idle EUP slot (no VPU divide).
        out = pl.reciprocal(1.0 + jnp.exp(-out), approx=True)

    # Store only the real output lanes (padded lanes are never written).
    o_ref[...] = out[:, : o_ref.shape[-1]].astype(o_ref.dtype)


def prepare_dqn_params(params):
    """One-time pad (to 128 lanes) + cast (weights->bf16, biases->f32).

    Call once and reuse the result across dqn_forward calls; this hoists the
    dozen tiny pad/convert XLA ops and ~75 KiB of weight traffic out of the
    per-call path.  Returns (prepared_params, osize).
    """
    isize, hsize = params["w1"].shape
    osize = params["w3"].shape[1]
    h_pad = _round_up(hsize, _LANE)
    o_pad = _round_up(osize, _LANE)
    prepared = dict(
        w1=_pad2(params["w1"], isize, h_pad).astype(jnp.bfloat16),
        b1=_pad2(params["b1"], 1, h_pad).astype(jnp.float32),
        w2=_pad2(params["w2"], h_pad, h_pad).astype(jnp.bfloat16),
        b2=_pad2(params["b2"], 1, h_pad).astype(jnp.float32),
        w3=_pad2(params["w3"], h_pad, o_pad).astype(jnp.bfloat16),
        b3=_pad2(params["b3"], 1, o_pad).astype(jnp.float32),
    )
    prepared = jax.tree_util.tree_map(jax.block_until_ready, prepared)
    return prepared, osize


@functools.partial(jax.jit, static_argnames=("osize", "do_clamp", "batch_tile"))
def dqn_forward(x, prepared, *, osize, do_clamp=False, batch_tile=None):
    """Fused DQN forward pass via pallas_call.

    x: [B, isize] float32.
    prepared: output of prepare_dqn_params (lane-padded bf16 weights / f32 biases).
    """
    B, isize = x.shape
    h_pad = prepared["w1"].shape[1]
    o_pad = prepared["w3"].shape[1]
    assert prepared["w1"].shape[0] == isize
    assert osize <= o_pad

    if batch_tile is None:
        batch_tile = _default_batch_tile(B, isize, h_pad, o_pad)
    assert batch_tile % _SUBLANE == 0, "batch_tile must be a multiple of 8 (f32 sublane)"
    B_pad = _round_up(B, batch_tile)
    grid = (B_pad // batch_tile,)

    # Pad only the batch dim of x; padded rows produce bias-only junk that is
    # sliced off below.  x stays f32 — the bf16 cast happens in-kernel.
    x_p = jnp.pad(x, ((0, B_pad - B), (0, 0))) if B_pad != B else x

    kernel = functools.partial(_dqn_kernel, do_clamp=do_clamp)

    # Weights/biases use full-array blocks with a constant index_map, so they
    # are fetched once and stay resident across the batch grid.
    full = lambda arr: pl.BlockSpec(arr.shape, lambda i: (0, 0))

    flops = 2 * B_pad * (isize * h_pad + h_pad * h_pad + h_pad * o_pad)
    bytes_accessed = (
        B_pad * isize * 4
        + (prepared["w1"].size + prepared["w2"].size + prepared["w3"].size) * 2
        + (prepared["b1"].size + prepared["b2"].size + prepared["b3"].size) * 4
        + B_pad * osize * 4)
    cost = pl.CostEstimate(
        flops=flops,
        transcendentals=(2 * B_pad * osize) if do_clamp else 0,
        bytes_accessed=bytes_accessed)

    out = pl.pallas_call(
        kernel,
        out_shape=jax.ShapeDtypeStruct((B_pad, osize), jnp.float32),
        grid_spec=pltpu.PrefetchScalarGridSpec(
            num_scalar_prefetch=0,
            grid=grid,
            in_specs=[
                pl.BlockSpec((batch_tile, isize), lambda i: (i, 0)),  # x tile (f32)
                full(prepared["w1"]), full(prepared["b1"]),
                full(prepared["w2"]), full(prepared["b2"]),
                full(prepared["w3"]), full(prepared["b3"]),
            ],
            out_specs=pl.BlockSpec((batch_tile, osize), lambda i: (i, 0)),
        ),
        compiler_params=pltpu.CompilerParams(
            dimension_semantics=("parallel",)),
        cost_estimate=cost,
    )(x_p, prepared["w1"], prepared["b1"], prepared["w2"], prepared["b2"],
      prepared["w3"], prepared["b3"])

    return out[:B] if B_pad != B else out


def init_dqn_params(key, isize, osize, hsize=50, zerofy=True):
    """Deterministic init mirroring torch.nn.Linear defaults (uniform +/- 1/sqrt(fan_in)),
    with zerofy zeroing L1/L2 exactly as in the PyTorch module."""
    ks = jax.random.split(key, 6)

    def linear(kw, kb, fan_in, fan_out):
        bound = 1.0 / jnp.sqrt(jnp.float32(fan_in))
        w = jax.random.uniform(kw, (fan_in, fan_out), jnp.float32, -bound, bound)
        b = jax.random.uniform(kb, (1, fan_out), jnp.float32, -bound, bound)
        return w, b

    w1, b1 = linear(ks[0], ks[1], isize, hsize)
    w2, b2 = linear(ks[2], ks[3], hsize, hsize)
    w3, b3 = linear(ks[4], ks[5], hsize, osize)

    if zerofy:
        w1 = jnp.zeros_like(w1); b1 = jnp.zeros_like(b1)
        w2 = jnp.zeros_like(w2); b2 = jnp.zeros_like(b2)

    return dict(w1=w1, b1=b1, w2=w2, b2=b2, w3=w3, b3=b3)


def _reference_forward(x, p, do_clamp):
    h = jnp.maximum(x @ p["w1"] + p["b1"], 0.0)
    h = jnp.maximum(h @ p["w2"] + p["b2"], 0.0)
    out = h @ p["w3"] + p["b3"]
    if do_clamp:
        out = jax.nn.sigmoid(out)
    return out


if __name__ == "__main__":
    key = jax.random.PRNGKey(0)
    k_x, k_p1, k_p2, k_x2 = jax.random.split(key, 4)

    B, isize, hsize, osize = 8, 32, 50, 4
    x = jax.random.normal(k_x, (B, isize), jnp.float32)

    # Default module config: zerofy=True, do_clamp=False (output == b3 exactly).
    raw_default = init_dqn_params(k_p1, isize, osize, hsize, zerofy=True)
    prep_default, osz = prepare_dqn_params(raw_default)
    out_default = jax.block_until_ready(
        dqn_forward(x, prep_default, osize=osz, do_clamp=False))
    ref_default = _reference_forward(x, raw_default, do_clamp=False)
    assert out_default.shape == (B, osize)
    assert jnp.allclose(out_default, ref_default, atol=1e-5, rtol=1e-5)

    # Non-trivial config: zerofy=False, do_clamp=True (all three matmuls + sigmoid).
    # Kernel uses bf16 matmul operands with f32 accumulation and an approx EUP
    # reciprocal in the sigmoid, so compare at bf16-level tolerance.
    raw_full = init_dqn_params(k_p2, isize, osize, hsize, zerofy=False)
    prep_full, osz = prepare_dqn_params(raw_full)
    out_full = jax.block_until_ready(
        dqn_forward(x, prep_full, osize=osz, do_clamp=True))
    ref_full = _reference_forward(x, raw_full, do_clamp=True)
    assert out_full.shape == (B, osize)
    assert jnp.allclose(out_full, ref_full, atol=2e-2, rtol=2e-2)

    # Multi-tile grid path: non-multiple-of-tile batch with an explicit tile.
    B2 = 40
    x2 = jax.random.normal(k_x2, (B2, isize), jnp.float32)
    out2 = jax.block_until_ready(
        dqn_forward(x2, prep_full, osize=osz, do_clamp=True, batch_tile=16))
    ref2 = _reference_forward(x2, raw_full, do_clamp=True)
    assert out2.shape == (B2, osize)
    assert jnp.allclose(out2, ref2, atol=2e-2, rtol=2e-2)

    print("KERNEL_OK")
</pallas_src>

<mosaic_0001>
module attributes {stable_mosaic.version = 11 : i64} {
  func.func @_dqn_kernel(%arg0: i32, %arg1: memref<8x32xf32, #tpu.memory_space<vmem>>, %arg2: memref<32x128xbf16, #tpu.memory_space<vmem>>, %arg3: memref<1x128xf32, #tpu.memory_space<vmem>>, %arg4: memref<128x128xbf16, #tpu.memory_space<vmem>>, %arg5: memref<1x128xf32, #tpu.memory_space<vmem>>, %arg6: memref<128x128xbf16, #tpu.memory_space<vmem>>, %arg7: memref<1x128xf32, #tpu.memory_space<vmem>>, %arg8: memref<8x4xf32, #tpu.memory_space<vmem>>) attributes {dimension_semantics = [#tpu.dimension_semantics<parallel>], iteration_bounds = array<i64: 1>, scalar_prefetch = 0 : i64, scratch_operands = 0 : i64, tpu.core_type = #tpu.core_type<tc>, window_params = [{transform_indices = @transform_0, window_bounds = array<i64: 8, 32>}, {pipeline_mode = #tpu.pipeline_mode<synchronous>, transform_indices = @transform_1, window_bounds = array<i64: 32, 128>}, {pipeline_mode = #tpu.pipeline_mode<synchronous>, transform_indices = @transform_2, window_bounds = array<i64: 1, 128>}, {pipeline_mode = #tpu.pipeline_mode<synchronous>, transform_indices = @transform_3, window_bounds = array<i64: 128, 128>}, {pipeline_mode = #tpu.pipeline_mode<synchronous>, transform_indices = @transform_4, window_bounds = array<i64: 1, 128>}, {pipeline_mode = #tpu.pipeline_mode<synchronous>, transform_indices = @transform_5, window_bounds = array<i64: 128, 128>}, {pipeline_mode = #tpu.pipeline_mode<synchronous>, transform_indices = @transform_6, window_bounds = array<i64: 1, 128>}, {transform_indices = @transform_7, window_bounds = array<i64: 8, 4>}]} {
    %c0 = arith.constant 0 : index
    %c0_0 = arith.constant 0 : index
    %0 = vector.load %arg1[%c0, %c0_0] : memref<8x32xf32, #tpu.memory_space<vmem>>, vector<8x32xf32>
    %1 = arith.truncf %0 : vector<8x32xf32> to vector<8x32xbf16>
    %c0_1 = arith.constant 0 : index
    %c0_2 = arith.constant 0 : index
    %2 = vector.load %arg2[%c0_1, %c0_2] : memref<32x128xbf16, #tpu.memory_space<vmem>>, vector<32x128xbf16>
    %cst = arith.constant dense<0.000000e+00> : vector<8x128xf32>
    %3 = tpu.matmul %1, %2, %cst {dimension_numbers = #tpu.dot_dimension_numbers<[1], [0], [0], [1], [0, 0, 1, 1], [], []>} : vector<8x32xbf16>, vector<32x128xbf16>, vector<8x128xf32> -> vector<8x128xf32>
    %c0_3 = arith.constant 0 : index
    %c0_4 = arith.constant 0 : index
    %4 = vector.load %arg3[%c0_3, %c0_4] : memref<1x128xf32, #tpu.memory_space<vmem>>, vector<1x128xf32>
    %5 = vector.broadcast %4 : vector<1x128xf32> to vector<8x128xf32>
    %6 = arith.addf %3, %5 : vector<8x128xf32>
    %cst_5 = arith.constant 0.000000e+00 : f32
    %7 = vector.broadcast %cst_5 : f32 to vector<8x128xf32>
    %8 = arith.maximumf %6, %7 : vector<8x128xf32>
    %9 = arith.truncf %8 : vector<8x128xf32> to vector<8x128xbf16>
    %c0_6 = arith.constant 0 : index
    %c0_7 = arith.constant 0 : index
    %10 = vector.load %arg4[%c0_6, %c0_7] : memref<128x128xbf16, #tpu.memory_space<vmem>>, vector<128x128xbf16>
    %cst_8 = arith.constant dense<0.000000e+00> : vector<8x128xf32>
    %11 = tpu.matmul %9, %10, %cst_8 {dimension_numbers = #tpu.dot_dimension_numbers<[1], [0], [0], [1], [0, 0, 1, 1], [], []>} : vector<8x128xbf16>, vector<128x128xbf16>, vector<8x128xf32> -> vector<8x128xf32>
    %c0_9 = arith.constant 0 : index
    %c0_10 = arith.constant 0 : index
    %12 = vector.load %arg5[%c0_9, %c0_10] : memref<1x128xf32, #tpu.memory_space<vmem>>, vector<1x128xf32>
    %13 = vector.broadcast %12 : vector<1x128xf32> to vector<8x128xf32>
    %14 = arith.addf %11, %13 : vector<8x128xf32>
    %cst_11 = arith.constant 0.000000e+00 : f32
    %15 = vector.broadcast %cst_11 : f32 to vector<8x128xf32>
    %16 = arith.maximumf %14, %15 : vector<8x128xf32>
    %17 = arith.truncf %16 : vector<8x128xf32> to vector<8x128xbf16>
    %c0_12 = arith.constant 0 : index
    %c0_13 = arith.constant 0 : index
    %18 = vector.load %arg6[%c0_12, %c0_13] : memref<128x128xbf16, #tpu.memory_space<vmem>>, vector<128x128xbf16>
    %cst_14 = arith.constant dense<0.000000e+00> : vector<8x128xf32>
    %19 = tpu.matmul %17, %18, %cst_14 {dimension_numbers = #tpu.dot_dimension_numbers<[1], [0], [0], [1], [0, 0, 1, 1], [], []>} : vector<8x128xbf16>, vector<128x128xbf16>, vector<8x128xf32> -> vector<8x128xf32>
    %c0_15 = arith.constant 0 : index
    %c0_16 = arith.constant 0 : index
    %20 = vector.load %arg7[%c0_15, %c0_16] : memref<1x128xf32, #tpu.memory_space<vmem>>, vector<1x128xf32>
    %21 = vector.broadcast %20 : vector<1x128xf32> to vector<8x128xf32>
    %22 = arith.addf %19, %21 : vector<8x128xf32>
    %23 = vector.extract_strided_slice %22 {offsets = [0, 0], sizes = [8, 4], strides = [1, 1]} : vector<8x128xf32> to vector<8x4xf32>
    %c0_17 = arith.constant 0 : index
    %c0_18 = arith.constant 0 : index
    %24 = vector.load %arg8[%c0_17, %c0_18] : memref<8x4xf32, #tpu.memory_space<vmem>>, vector<8x4xf32>
    tpu.vector_store %arg8[%c0_17, %c0_18], %23 {strides = array<i32>} : memref<8x4xf32, #tpu.memory_space<vmem>>, vector<8x4xf32>,
    return
  }
  func.func @transform_0(%arg0: i32) -> (i32, i32) {
    %c0_i32 = arith.constant 0 : i32
    %c0_i32_0 = arith.constant 0 : i32
    return %arg0, %c0_i32 : i32, i32
  }
  func.func @transform_1(%arg0: i32) -> (i32, i32) {
    %c0_i32 = arith.constant 0 : i32
    %c0_i32_0 = arith.constant 0 : i32
    %c0_i32_1 = arith.constant 0 : i32
    return %c0_i32, %c0_i32_0 : i32, i32
  }
  func.func @transform_2(%arg0: i32) -> (i32, i32) {
    %c0_i32 = arith.constant 0 : i32
    %c0_i32_0 = arith.constant 0 : i32
    %c0_i32_1 = arith.constant 0 : i32
    return %c0_i32, %c0_i32_0 : i32, i32
  }
  func.func @transform_3(%arg0: i32) -> (i32, i32) {
    %c0_i32 = arith.constant 0 : i32
    %c0_i32_0 = arith.constant 0 : i32
    %c0_i32_1 = arith.constant 0 : i32
    return %c0_i32, %c0_i32_0 : i32, i32
  }
  func.func @transform_4(%arg0: i32) -> (i32, i32) {
    %c0_i32 = arith.constant 0 : i32
    %c0_i32_0 = arith.constant 0 : i32
    %c0_i32_1 = arith.constant 0 : i32
    return %c0_i32, %c0_i32_0 : i32, i32
  }
  func.func @transform_5(%arg0: i32) -> (i32, i32) {
    %c0_i32 = arith.constant 0 : i32
    %c0_i32_0 = arith.constant 0 : i32
    %c0_i32_1 = arith.constant 0 : i32
    return %c0_i32, %c0_i32_0 : i32, i32
  }
  func.func @transform_6(%arg0: i32) -> (i32, i32) {
    %c0_i32 = arith.constant 0 : i32
    %c0_i32_0 = arith.constant 0 : i32
    %c0_i32_1 = arith.constant 0 : i32
    return %c0_i32, %c0_i32_0 : i32, i32
  }
  func.func @transform_7(%arg0: i32) -> (i32, i32) {
    %c0_i32 = arith.constant 0 : i32
    %c0_i32_0 = arith.constant 0 : i32
    return %arg0, %c0_i32 : i32, i32
  }
}

</mosaic_0001>

<bundles_post_ra>
// kernel: dqn_forward.1
= control target key start
LH: loop header
LB: loop body
LE: loop exit
PB: predicated region body
PF: predicated region fallthrough
CT: control target
= control target key end

     0   :  { %12 = vsyncpa [#allocation3], 0  ;;  %s613_s0 = inlined_call_operand.hbm [shape: f32[8,32], index: 0, kind: input, shape index: {}]   ;;  %s614_s1 = inlined_call_operand.hbm [shape: bf16[32,128], index: 1, kind: input, shape index: {}]   ;;  %s615_s2 = inlined_call_operand.hbm [shape: f32[1,128], index: 2, kind: input, shape index: {}]   ;;  %s616_s3 = inlined_call_operand.hbm [shape: bf16[128,128], index: 3, kind: input, shape index: {}]   ;;  %s617_s4 = inlined_call_operand.vmem [shape: f32[1,128], index: 4, kind: input, shape index: {}]   ;;  %s618_s5 = inlined_call_operand.hbm [shape: bf16[128,128], index: 5, kind: input, shape index: {}]   ;;  %s619_s6 = inlined_call_operand.vmem [shape: f32[1,128], index: 6, kind: input, shape index: {}]   ;;  %s620_s7 = inlined_call_operand.vmem [shape: f32[8,4], index: 7, kind: output, shape index: {}]  }
   0x1   :  { %13 = vsyncpa [#allocation5], 0  ;;  %s30_s26 = sshll.u32 %s614_s1, 4  ;;  %s31_s26 = int_to_ptr.hbm [resolvable:$true] %s30_s26 }
   0x2   :  { %14 = vsyncpa [#allocation8], 0  ;;  %s542_s27 = smov [#allocation4]   ;;  %s54_s8 = sshll.u32 %s616_s3, 4  ;;  %s55_s8 = int_to_ptr.hbm [resolvable:$true] %s54_s8 }
   0x3   :  { %s32_s28 = sshll.u32 %s542_s27, 4  ;;  %s543_s9 = smov 64   ;;  %s33_s28 = int_to_ptr.vmem [resolvable:$true] %s32_s28 }
   0x4   :  { %s544_s10 = smov 4   ;;  %s545_s11 = smov [#allocation7]  }
   0x5   :  { %38 = dma.hbm_to_vmem [thread:$0]  %s31_s26, 256, %s33_s28, [#allocation5], %s543_s9, %s543_s9, %s544_s10  }
   0x6   :  { %s56_s12 = sshll.u32 %s545_s11, 4  ;;  %s20_s15 = sshll.u32 %s613_s0, 4  ;;  %s57_s12 = int_to_ptr.vmem [resolvable:$true] %s56_s12  ;;  %s21_s15 = int_to_ptr.hbm [resolvable:$true] %s20_s15 }
   0x7   :  { %62 = dma.hbm_to_vmem [thread:$0]  %s55_s8, 1024, %s57_s12, [#allocation8], %s543_s9, %s543_s9, %s544_s10  }
   0x8   :  { %s44_s17 = sshll.u32 %s615_s2, 4  ;;  %s546_s18 = smov [#allocation2]   ;;  %s45_s17 = int_to_ptr.hbm [resolvable:$true] %s44_s17 }
   0x9   :  { %s22_s19 = sshll.u32 %s546_s18, 4  ;;  %s547_s3 = smov [#allocation6]   ;;  %s23_s19 = int_to_ptr.vmem [resolvable:$true] %s22_s19 }
   0xa   :  { %25 = dma.hbm_to_vmem [thread:$0]  %s21_s15, 128, %s23_s19, [#allocation3]  }
   0xb   :  { %s46_s20 = sshll.u32 %s547_s3, 4  ;;  %s69_s23 = sshll.u32 %s618_s5, 4  ;;  %s47_s20 = int_to_ptr.vmem [resolvable:$true] %s46_s20  ;;  %s70_s23 = int_to_ptr.hbm [resolvable:$true] %s69_s23 }
   0xc   :  { %49 = dma.hbm_to_vmem [thread:$0]  %s45_s17, 16, %s47_s20, [#allocation5]  }
   0xd   :  { %s548_s0 = smov [#allocation9]  }
   0xe   :  { %s71_s24 = sshll.u32 %s548_s0, 4  ;;  %s72_s24 = int_to_ptr.vmem [resolvable:$true] %s71_s24 }
   0xf   :  { %77 = dma.hbm_to_vmem [thread:$0]  %s70_s23, 1024, %s72_s24, [#allocation8], %s543_s9, %s543_s9, %s544_s10  }
  0x10   :  { %536 = dma.done.wait [#allocation3], 128  }
  0x11   :  { %537 = vsyncadd [#allocation3], 4294967168 }
  0x12   :  { %538 = dma.done.wait [#allocation5], 272  }
  0x13   :  { %539 = vsyncadd [#allocation5], 4294967024 }
  0x14   :  { %540 = dma.done.wait [#allocation8], 2048  }
  0x15   :  { %541 = vsyncadd [#allocation8], 4294965248  ;;  %v389_v0 = vld [vmem:[#allocation4 + $0x8] sm:$0xff]  ;;  %v388_v2 = vld [vmem:[#allocation4] sm:$0xff]  ;;  %vm123_vm0 = vcmask 261120   ;;  %vm306_vm1 = vcmask 31744  }
  0x16   :  { %v397_v1 = vld [vmem:[#allocation7 + $0x38] sm:$0xff]  ;;  %133 = vmatpush.bf16.msra.mxu0 %v389_v0  ;;  %v101_v3 = vld [vmem:[#allocation2] sm:$0xff]  ;;  %v396_v4 = vld [vmem:[#allocation7 + $0x30] sm:$0xff] }
  0x17   :  { %210 = vmatpush.bf16.msra.mxu1 %v397_v1  ;;  %v102_v5 = vpack.c.bf16 %v101_v3, %v101_v3  ;;  %v395_v6 = vld [vmem:[#allocation7 + $0x28] sm:$0xff]  ;;  %v394_v7 = vld [vmem:[#allocation7 + $0x20] sm:$0xff]  ;;  %v393_v8 = vld [vmem:[#allocation7 + $0x18] sm:$0xff] }
  0x18   :  { %v392_v9 = vld [vmem:[#allocation7 + $0x10] sm:$0xff]  ;;  %v391_v10 = vld [vmem:[#allocation7 + $0x8] sm:$0xff]  ;;  %v390_v11 = vld [vmem:[#allocation7] sm:$0xff] }
  0x19   :  { %v405_v12 = vld [vmem:[#allocation9 + $0x38] sm:$0xff]  ;;  %v404_v13 = vld [vmem:[#allocation9 + $0x30] sm:$0xff]  ;;  %v403_v14 = vld [vmem:[#allocation9 + $0x28] sm:$0xff] }
  0x1a   :  { %134 = vmatpush.bf16.msra.mxu0 %v388_v2  ;;  %293 = vmatpush.bf16.msra.mxu2 %v405_v12  ;;  %v402_v15 = vld [vmem:[#allocation9 + $0x20] sm:$0xff]  ;;  %v401_v16 = vld [vmem:[#allocation9 + $0x18] sm:$0xff]  ;;  %v400_v17 = vld [vmem:[#allocation9 + $0x10] sm:$0xff] }
  0x1b   :  { %211 = vmatpush.bf16.msra.mxu1 %v396_v4  ;;  %v413_v18 = vld [vmem:[#allocation6] ss:$0 sm:$0xff]  ;;  %v399_v24 = vld [vmem:[#allocation9 + $0x8] sm:$0xff]  ;;  %v398_v25 = vld [vmem:[#allocation9] sm:$0xff] }
  0x1c   :  { %v414_v26 = vld [vmem:[%s617_s4] ss:$0 sm:$0xff] }
  0x1d   :  { %323 = vmatmul.msk.bf16.vlgmr.msra.gmra.mxu0 %vm123_vm0, %v102_v5  ;;  %v415_v32 = vld [vmem:[%s619_s6] ss:$0 sm:$0xff] }
  0x1e   :  { %294 = vmatpush.bf16.msra.mxu2 %v404_v13 }
  0x1f   :  { %212 = vmatpush.bf16.msra.mxu1 %v395_v6 }
  0x22   :  { %295 = vmatpush.bf16.msra.mxu2 %v403_v14 }
  0x23   :  { %213 = vmatpush.bf16.msra.mxu1 %v394_v7 }
  0x26   :  { %296 = vmatpush.bf16.msra.mxu2 %v402_v15 }
  0x27   :  { %214 = vmatpush.bf16.msra.mxu1 %v393_v8 }
  0x2a   :  { %297 = vmatpush.bf16.msra.mxu2 %v401_v16 }
  0x2b   :  { %215 = vmatpush.bf16.msra.mxu1 %v392_v9 }
  0x2e   :  { %298 = vmatpush.bf16.msra.mxu2 %v400_v17 }
  0x2f   :  { %216 = vmatpush.bf16.msra.mxu1 %v391_v10 }
  0x32   :  { %299 = vmatpush.bf16.msra.mxu2 %v399_v24 }
  0x33   :  { %217 = vmatpush.bf16.msra.mxu1 %v390_v11 }
  0x36   :  { %300 = vmatpush.bf16.msra.mxu2 %v398_v25 }
  0x9a   :  { %v136_v19 = vpop.f32.mrf.mxu0 }
  0x9b   :  { %v137_v20 = vadd.f32 %v413_v18, %v136_v19 }
  0x9d   :  { %v140_v21 = vmax.f32 %v137_v20, 0.0 }
  0x9f   :  { %v141_v22 = vpack.c.bf16 %v140_v21, %v140_v21 }
  0xa1   :  { %218 = vmatmul.bf16.vlgmr.msra.gmra.mxu1 %v141_v22 }
  0xa2   :  { %v138_v23 = vpop.f32.mrf.mxu0 }
 0x11e   :  { %v219_v27 = vpop.f32.mrf.mxu1 }
 0x11f   :  { %v220_v28 = vadd.f32 %v414_v26, %v219_v27 }
 0x121   :  { %v223_v29 = vmax.f32 %v220_v28, 0.0 }
 0x123   :  { %v224_v30 = vpack.c.bf16 %v223_v29, %v223_v29 }
 0x125   :  { %301 = vmatmul.bf16.vlgmr.msra.gmra.mxu2 %v224_v30 }
 0x126   :  { %v221_v31 = vpop.f32.mrf.mxu1 }
 0x1a8   :  { %v302_v33 = vpop.f32.mrf.mxu2 }
 0x1a9   :  { %v303_v34 = vadd.f32 %v415_v32, %v302_v33 }
 0x1ab   :  { %307 = vst.msk [vmem:[%s620_s7] sm:$0xff] %vm306_vm1, %v303_v34 }
 0x1b0   :  { %v304_v35 = vpop.f32.mrf.mxu2 }
 0x1b1   :  { %312 = vsyncpa [#allocation3], 1 }
 0x1b2   :  { %313 = vsyncpa [#allocation5], 1 }
 0x1b3   :  { %314 = vsyncpa [#allocation8], 1 }

</bundles_post_ra>
